<compile_context>
chip_gen: v6e
topology: v6e:2x2x1
jax: 0.10.0
libtpu: 0.0.40
codegen_flags: <defaults>
</compile_context>

<pallas_src>
import jax
import jax.numpy as jnp
from jax import lax
from jax.experimental import pallas as pl
from jax.experimental.pallas import tpu as pltpu

EPS = 1e-10

_LANE = 128
_TARGET_BYTES_PER_BUFFER = 2 * 1024 * 1024   # ~2 MiB of input traffic per grid step
_MIN_GRID_BLOCKS = 8                         # keep both v7x TensorCores busy


def _l2norm_kernel(x_ref, o_ref):
    """Row-wise L2 normalization of one (block_m, d_pad) tile."""
    x = x_ref[...].astype(jnp.float32)
    ss = jnp.sum(x * x, axis=-1, keepdims=True)   # XLU cross-lane reduction
    inv = lax.rsqrt(ss + EPS)                     # EUP; == 1/sqrt(sum + eps)
    o_ref[...] = (x * inv).astype(o_ref.dtype)    # VPU scale


def _row_block(n, d_pad, itemsize):
    """Byte-targeted row-block size.

    Big enough to amortize the ~0.35us/step pipeline overhead, small enough
    to (a) keep >= _MIN_GRID_BLOCKS steps so the parallel row axis splits
    across TensorCores and (b) keep the double-buffered footprint well under
    v7x's 64 MiB VMEM.
    """
    row_mult = 8 if itemsize >= 4 else (16 if itemsize == 2 else 32)
    bm = _TARGET_BYTES_PER_BUFFER // (d_pad * itemsize)
    bm = max((bm // row_mult) * row_mult, row_mult)
    # Keep enough grid blocks for megacore splitting of the row axis.
    if n >= _MIN_GRID_BLOCKS * row_mult:
        cap = pl.cdiv(n, _MIN_GRID_BLOCKS)
        cap = max(((cap + row_mult - 1) // row_mult) * row_mult, row_mult)
        bm = min(bm, cap)
    if bm >= n:
        return n  # single full-extent block (exempt from the (8,128) rule)
    return bm


@jax.jit
def l2norm(x):
    """L2-normalize each row of a 2-D array (matches torch L2Norm, dim=1)."""
    n, d = x.shape
    itemsize = jnp.dtype(x.dtype).itemsize

    # Lane-dense feature axis: pad to a multiple of 128 (zeros add 0 to the
    # sum of squares, so the normalization of real columns is unchanged).
    d_pad = max(_LANE, ((d + _LANE - 1) // _LANE) * _LANE)
    x_in = x if d_pad == d else jnp.pad(x, ((0, 0), (0, d_pad - d)))

    bm = _row_block(n, d_pad, itemsize)
    grid = (pl.cdiv(n, bm),)

    # Explicit VMEM budget for the chosen tile: 2 buffers x (in + out) plus
    # in-kernel f32 temporaries, with headroom.  Clamp to v7x's 64 MiB.
    vmem_bytes = 4 * bm * d_pad * itemsize + 4 * bm * d_pad * 4
    vmem_bytes = int(vmem_bytes * 1.25) + (2 << 20)
    vmem_bytes = max(8 << 20, min(vmem_bytes, 64 << 20))

    y = pl.pallas_call(
        _l2norm_kernel,
        out_shape=jax.ShapeDtypeStruct((n, d_pad), x.dtype),
        grid=grid,
        in_specs=[pl.BlockSpec((bm, d_pad), lambda i: (i, 0))],
        out_specs=pl.BlockSpec((bm, d_pad), lambda i: (i, 0)),
        compiler_params=pltpu.CompilerParams(
            dimension_semantics=("parallel",),
            vmem_limit_bytes=vmem_bytes,
        ),
    )(x_in)

    return y if d_pad == d else y[:, :d]


if __name__ == "__main__":
    key = jax.random.PRNGKey(0)
    k0, k1 = jax.random.split(key)

    # Primary case consistent with the module: (batch of descriptors, D=128).
    N, D = 256, 128
    x = jax.random.normal(k0, (N, D), jnp.float32)
    y = l2norm(x)
    jax.block_until_ready(y)

    ref = x / jnp.sqrt(jnp.sum(x * x, axis=1, keepdims=True) + EPS)
    assert y.shape == x.shape, y.shape
    assert bool(jnp.all(jnp.isfinite(y)))
    max_err = float(jnp.max(jnp.abs(y - ref)))
    assert max_err < 1e-5, max_err

    # Ragged case: D not a lane multiple (padding path) and a partial last
    # row block (n % bm != 0).
    x2 = jax.random.normal(k1, (100, 96), jnp.float32)
    y2 = l2norm(x2)
    jax.block_until_ready(y2)
    ref2 = x2 / jnp.sqrt(jnp.sum(x2 * x2, axis=1, keepdims=True) + EPS)
    assert y2.shape == x2.shape, y2.shape
    assert bool(jnp.all(jnp.isfinite(y2)))
    max_err2 = float(jnp.max(jnp.abs(y2 - ref2)))
    assert max_err2 < 1e-5, max_err2

    print("KERNEL_OK")
</pallas_src>

<mosaic_0001>
module attributes {stable_mosaic.version = 11 : i64} {
  func.func @_l2norm_kernel(%arg0: i32, %arg1: memref<32x128xf32, #tpu.memory_space<vmem>>, %arg2: memref<32x128xf32, #tpu.memory_space<vmem>>) attributes {dimension_semantics = [#tpu.dimension_semantics<parallel>], iteration_bounds = array<i64: 8>, scalar_prefetch = 0 : i64, scratch_operands = 0 : i64, tpu.core_type = #tpu.core_type<tc>, window_params = [{transform_indices = @transform_0, window_bounds = array<i64: 32, 128>}, {transform_indices = @transform_1, window_bounds = array<i64: 32, 128>}]} {
    %c0 = arith.constant 0 : index
    %c0_0 = arith.constant 0 : index
    %0 = vector.load %arg1[%c0, %c0_0] : memref<32x128xf32, #tpu.memory_space<vmem>>, vector<32x128xf32>
    %1 = arith.mulf %0, %0 : vector<32x128xf32>
    %cst = arith.constant dense<0.000000e+00> : vector<32xf32>
    %2 = vector.multi_reduction <add>, %1, %cst [1] : vector<32x128xf32> to vector<32xf32>
    %3 = vector.shape_cast %2 : vector<32xf32> to vector<32x1xf32>
    %cst_1 = arith.constant 1.000000e-10 : f32
    %4 = vector.broadcast %cst_1 : f32 to vector<32x1xf32>
    %5 = arith.addf %3, %4 : vector<32x1xf32>
    %6 = math.rsqrt %5 : vector<32x1xf32>
    %7 = vector.broadcast %6 : vector<32x1xf32> to vector<32x128xf32>
    %8 = arith.mulf %0, %7 : vector<32x128xf32>
    %c0_2 = arith.constant 0 : index
    %c0_3 = arith.constant 0 : index
    %9 = vector.load %arg2[%c0_2, %c0_3] : memref<32x128xf32, #tpu.memory_space<vmem>>, vector<32x128xf32>
    tpu.vector_store %arg2[%c0_2, %c0_3], %8 {strides = array<i32>} : memref<32x128xf32, #tpu.memory_space<vmem>>, vector<32x128xf32>,
    return
  }
  func.func @transform_0(%arg0: i32) -> (i32, i32) {
    %c0_i32 = arith.constant 0 : i32
    %c0_i32_0 = arith.constant 0 : i32
    return %arg0, %c0_i32 : i32, i32
  }
  func.func @transform_1(%arg0: i32) -> (i32, i32) {
    %c0_i32 = arith.constant 0 : i32
    %c0_i32_0 = arith.constant 0 : i32
    return %arg0, %c0_i32 : i32, i32
  }
}

</mosaic_0001>

<bundles_post_ra>
// kernel: l2norm.1
= control target key start
LH: loop header
LB: loop body
LE: loop exit
PB: predicated region body
PF: predicated region fallthrough
CT: control target
= control target key end

     0   :  { %6 = vsyncpa [#allocation3], 0  ;;  %s596_s0 = inlined_call_operand.hbm [shape: f32[256,128], index: 0, kind: input, shape index: {}]   ;;  %s597_s1 = inlined_call_operand.hbm [shape: f32[256,128], index: 1, kind: output, shape index: {}]  }
   0x1   :  { %8 = vsyncpa [#allocation3 + $0x1], 0 }
   0x2   :  { %9 = vsyncpa [#allocation4], 0 }
   0x3   :  { %11 = vsyncpa [#allocation4 + $0x1], 0  ;;  %s440_s6 = smov 0   ;;  %s442_s7 = smov 0  }
   0x4   :  { %s444_s8 = smov 0   ;;  %s446_s9 = smov 0  }
   0x5 LB: > { %s461_s10 = sadd.s32 4294967295, %s422_s9   ;;  %s256_s11 = sadd.s32 4294967294, %s422_s9   ;;  %s422_s9 = sphi %s446_s9, %s611_s9   ;;  %s418_s8 = sphi %s444_s8, %s610_s8   ;;  %s414_s7 = sphi %s442_s7, %s609_s7   ;;  %s410_s6 = sphi %s440_s6, %s608_s6  }
   0x6   : > { %s465_s12 = sadd.s32 1, %s422_s9   ;;  %s24_s13 = sadd.s32 1, %s418_s8 }
   0x7   : > { %s21_s14 = ssub.s32 %s422_s9, %s465_s12  ;;  %p31_p0 = scmp.ne.s32.totalorder %s418_s8, %s414_s7 }
   0x8   : > { %p22_p1 = scmp.eq.s32.totalorder %s21_s14, 0  ;;  %p32_p2 = scmp.eq.s32.totalorder %s422_s9, 0 }
   0x9   : > { %p37_p3 = scmp.ne.s32.totalorder %s414_s7, %s410_s6  ;;  %p38_p4 = scmp.eq.s32.totalorder %s461_s10, 0 }
   0xa   : > { %s477_s15 = scalar_select %p22_p1, %s418_s8, %s24_s13  }
   0xb   : > { %p479_p5 = por %p32_p2, %p31_p0  ;;  %p483_p6 = por %p38_p4, %p37_p3 }
   0xc   : > { %p61_p7 = scmp.eq.s32.totalorder %s461_s10, 7  ;;  %p67_p8 = scmp.eq.s32.totalorder %s256_s11, 7 }
   0xd   : > { %s601_s17 = scalar_select %p483_p6, 1, 0 }
   0xe   : > { %p284_p9 = scmp.lt.s32.totalorder %s422_s9, 8  ;;  %p489_p10 = por %p61_p7, %p31_p0 }
   0xf   : > { %p493_p11 = por %p67_p8, %p37_p3  ;;  %s87_s20 = sand.u32 1, %s418_s8  }
  0x10   : > { %s602_s18 = scalar_select %p489_p10, 1, 0 }
  0x11   : > { %s603_s19 = scalar_select %p493_p11, 1, 0 }
  0x12   : > { %s270_s21 = sshll.u32 %s422_s9, 9  ;;  %s259_s22 = sshll.u32 %s87_s20, 5 }
  0x13   : > { %s502_s25 = scalar_lea.hbm %s596_s0, %s270_s21  ;;  %s91_s26 = scalar_lea.vmem [#allocation2], %s259_s22 }
  0x14   : > { %s98_s27 = sshll.u32 %s91_s26, 4  ;;  %p506_p12 = pnand %p284_p9, %p479_p5  ;;  %s510_s27 = int_to_ptr.vmem [resolvable:$true] %s98_s27 }
  0x15   : > { %s512_s29 = scalar_lea.sflag [#allocation3], %s87_s20  ;;  %s330_s30 = scalar_lea.hbm %s502_s25, 512 }
  0x16   : > { %p331_p13 = scmp.ne.s32.totalorder %s502_s25, %s330_s30  ;;  %p332_p0 = pneg %p506_p12 }
  0x17   : > { %s335_s4 = scalar_lea.hbm %s596_s0, 4096  ;;  %p336_p3 = scmp.lt.s32.totalorder %s502_s25, %s596_s0 }
  0x18   : > { %p333_p1 = pnand %p332_p0, %p331_p13  ;;  %p337_p4 = scmp.lt.s32.totalorder %s335_s4, %s330_s30 }
  0x1a   : > { %p334_p2 = pneg %p333_p1  ;;  %p338_p5 = por %p337_p4, %p336_p3 }
  0x1c   : > { %p339_p7 = pnand %p338_p5, %p334_p2 }
  0x1e   : > { %342 = shalt.err (!%p339_p7)
}
  0x1f   : > { %s343_s13 = scalar_lea.vmem %s510_s27, 512  ;;  %s424_s14 = smov [#allocation2]  }
  0x20   : > { %p344_p8 = scmp.ne.s32.totalorder %s510_s27, %s343_s13  ;;  %s348_s16 = sshll.u32 %s424_s14, 4  ;;  %s349_s16 = int_to_ptr.vmem [resolvable:$false] %s348_s16 }
  0x21   : > { %s350_s20 = scalar_lea.vmem %s349_s16, 1024  ;;  %p351_p1 = scmp.lt.s32.totalorder %s510_s27, %s349_s16 }
  0x22   : > { %p346_p9 = pnand %p344_p8, %p332_p0  ;;  %p352_p11 = scmp.lt.s32.totalorder %s350_s20, %s343_s13 }
  0x24   : > { %p347_p13 = pneg %p346_p9  ;;  %p353_p10 = por %p352_p11, %p351_p1 }
  0x26   : > { %p354_p6 = pnand %p353_p10, %p347_p13 }
  0x28   : > { %357 = shalt.err (!%p354_p6)
}
  0x29   : > { %s425_s21 = smov 128   ;;  %s426_s22 = smov 8  }
  0x2a   : > { %279 = dma.hbm_to_vmem [thread:$0]  (!%p506_p12), %s502_s25, 512, %s510_s27, %s512_s29, %s425_s21, %s425_s21, %s426_s22  }
  0x2b   : > { %p262_p0 = scmp.ge.s32.totalorder %s422_s9, 1  ;;  %p106_p2 = scmp.lt.s32.totalorder %s422_s9, 9 }
  0x2d   : > { %p107_p3 = pnand %p262_p0, %p106_p2 }
  0x2e   : > { %s536_s23 = sand.u32 (!%p107_p3), 1, %s414_s7   ;;  %p605_p6 = scmp.ne.s32.totalorder (!%p107_p3), %s601_s17, 0 }
  0x2f   : > { %110 = sbr.rel (%p107_p3) target bundleno = 231 (0xe7), region = 24  ;;  %s263_s24 = sshll.u32 (!%p107_p3), %s536_s23, 5 }
  0x30   : > { %s113_s26 = scalar_lea.sflag (!%p107_p3), [#allocation3], %s536_s23  ;;  %s116_s30 = scalar_lea.vmem (!%p107_p3), [#allocation2], %s263_s24 }
  0x34   : > { %401 = dma.done.wait (%p605_p6), %s113_s26, 512  }
  0x35   : > { %403 = vsyncadd (%p605_p6), %s113_s26, 4294966784  ;;  %v139_v0 = vld [vmem:[%s116_s30 + $0x10] sm:$0xff]  ;;  %v137_v1 = vld [vmem:[%s116_s30] sm:$0xff]  ;;  %s271_s17 = sshll.u32 %s461_s10, 9  ;;  %s134_s25 = scalar_lea.vmem [#allocation5], %s263_s24 }
  0x36   : > { %v140_v2 = vld [vmem:[%s116_s30 + $0x18] sm:$0xff]  ;;  %v143_v3 = vmul.f32 %v139_v0, %v139_v0  ;;  %v141_v4 = vmul.f32 %v137_v1, %v137_v1  ;;  %v138_v5 = vld [vmem:[%s116_s30 + $0x8] sm:$0xff]  ;;  %s183_s27 = sshll.u32 %s134_s25, 4  ;;  %s552_s2 = scalar_lea.hbm %s597_s1, %s271_s17  ;;  %s554_s27 = int_to_ptr.vmem [resolvable:$true] %s183_s27 }
  0x37   : > { %v144_v6 = vmul.f32 %v140_v2, %v140_v2  ;;  %v142_v7 = vmul.f32 %v138_v5, %v138_v5  ;;  %s170_s10 = scalar_lea.sflag [#allocation4], %s536_s23  ;;  %s358_s3 = scalar_lea.vmem %s554_s27, 512 }
  0x38   : > { %149 = vadd.xlane.f32.xlu1 %v143_v3  ;;  %145 = vadd.xlane.f32.xlu0 %v141_v4  ;;  %p359_p10 = scmp.ne.s32.totalorder %s554_s27, %s358_s3  ;;  %p606_p11 = scmp.ne.s32.totalorder %s602_s18, 0 }
  0x39   : > { %s427_s4 = smov [#allocation5]  }
  0x3a   : > { %p360_p12 = pnand %p359_p10, %p606_p11  ;;  %s362_s5 = sshll.u32 %s427_s4, 4  ;;  %s363_s5 = int_to_ptr.vmem [resolvable:$false] %s362_s5 }
  0x3b   : > { %s364_s11 = scalar_lea.vmem %s363_s5, 1024  ;;  %p365_p5 = scmp.lt.s32.totalorder %s554_s27, %s363_s5 }
  0x3c   : > { %151 = vadd.xlane.f32.xlu1 %v144_v6  ;;  %147 = vadd.xlane.f32.xlu0 %v142_v7  ;;  %p361_p4 = pneg %p360_p12  ;;  %p366_p7 = scmp.lt.s32.totalorder %s364_s11, %s358_s3 }
  0x3e   : > { %p367_p8 = por %p366_p7, %p365_p5 }
  0x40   : > { %p368_p9 = pnand %p367_p8, %p361_p4 }
  0xc1   : > { %v150_v8 = vpop.xlane.xlu1 %149  ;;  %v146_v9 = vpop.xlane.xlu0 %145 }
  0xc2   : > { %v155_v10 = vadd.f32 1e-10, %v150_v8  ;;  %v153_v11 = vadd.f32 1e-10, %v146_v9 }
  0xc4   : > { %322 = vrsqrt.f32 %v155_v10 }
  0xc5   : > { %324 = vrsqrt.f32 %v153_v11  ;;  %v152_v12 = vpop.xlane.xlu1 %151  ;;  %v148_v13 = vpop.xlane.xlu0 %147 }
  0xc6   : > { %v156_v14 = vadd.f32 1e-10, %v152_v12  ;;  %v154_v15 = vadd.f32 1e-10, %v148_v13 }
  0xc8   : > { %326 = vrsqrt.f32 %v156_v14 }
  0xc9   : > { %328 = vrsqrt.f32 %v154_v15 }
  0xd1   : > { %v323_v16 = vpop.eup %322 }
  0xd2   : > { %v325_v17 = vpop.eup %324  ;;  %v163_v18 = vmul.f32 %v323_v16, %v139_v0 }
  0xd3   : > { %v161_v19 = vmul.f32 %v325_v17, %v137_v1 }
  0xd4   : > { %167 = vst [vmem:[%s134_s25 + $0x10] sm:$0xff] %v163_v18 }
  0xd5   : > { %v327_v20 = vpop.eup %326  ;;  %165 = vst [vmem:[%s134_s25] sm:$0xff] %v161_v19 }
  0xd6   : > { %v329_v21 = vpop.eup %328  ;;  %v164_v22 = vmul.f32 %v327_v20, %v140_v2 }
  0xd7   : > { %v162_v23 = vmul.f32 %v329_v21, %v138_v5 }
  0xd8   : > { %168 = vst [vmem:[%s134_s25 + $0x18] sm:$0xff] %v164_v22 }
  0xd9   : > { %166 = vst [vmem:[%s134_s25 + $0x8] sm:$0xff] %v162_v23 }
  0xda   : > { %371 = shalt.err (!%p368_p9)
}
  0xdb   : > { %s372_s13 = scalar_lea.hbm %s552_s2, 512  ;;  %s376_s20 = scalar_lea.hbm %s597_s1, 4096 }
  0xdc   : > { %p373_p13 = scmp.ne.s32.totalorder %s552_s2, %s372_s13  ;;  %p377_p2 = scmp.lt.s32.totalorder %s552_s2, %s597_s1 }
  0xdd   : > { %p378_p3 = scmp.lt.s32.totalorder %s376_s20, %s372_s13 }
  0xde   : > { %p374_p1 = pnand %p373_p13, %p606_p11 }
  0xdf   : > { %p379_p6 = por %p378_p3, %p377_p2 }
  0xe0   : > { %p375_p0 = pneg %p374_p1 }
  0xe2   : > { %p380_p10 = pnand %p379_p6, %p375_p0 }
  0xe4   : > { %383 = shalt.err (!%p380_p10)
}
  0xe5   : > { %s428_s24 = smov 128   ;;  %s429_s26 = smov 8  }
  0xe6   : > { %274 = dma.vmem_to_hbm [thread:$0]  (%p606_p11), %s554_s27, 512, %s552_s2, %s170_s10, %s428_s24, %s428_s24, %s429_s26  }
  0xe7 PF: > { %p285_p12 = scmp.ge.s32.totalorder %s422_s9, 2  ;;  %s198_s30 = sand.u32 1, %s410_s6  }
  0xe8   : > { %p607_p4 = scmp.ne.s32.totalorder %s603_s19, 0  ;;  %s199_s17 = scalar_lea.sflag [#allocation4], %s198_s30 }
  0xea   : > { %p281_p5 = pnand %p285_p12, %p607_p4 }
  0xec   : > { %p282_p7 = pneg %p281_p5 }
  0xee   : > { %405 = dma.done.wait (%p282_p7), %s199_s17, 512  }
  0xef   : > { %407 = vsyncadd (%p282_p7), %s199_s17, 4294966784  ;;  %p14_p8 = scmp.ge.s32.totalorder %s465_s12, 10   ;;  %s608_s6 = smov %s414_s7 }
  0xf0   : > { %s609_s7 = smov %s418_s8  ;;  %s610_s8 = smov %s477_s15 }
  0xf1   : > { %s611_s9 = smov %s465_s12  ;;  %16 = sbr.rel (!%p14_p8) target bundleno = 5 (0x5), region = 69 }
  0xf6   :  { %204 = vsyncpa [#allocation3], 1 }
  0xf7   :  { %206 = vsyncpa [#allocation3 + $0x1], 1 }
  0xf8   :  { %207 = vsyncpa [#allocation4], 1 }
  0xf9   :  { %209 = vsyncpa [#allocation4 + $0x1], 1 }

</bundles_post_ra>
